<compile_context>
chip_gen: v7x
topology: tpu7x:2x2x1
jax: 0.10.0
libtpu: 0.0.40
codegen_flags: <defaults>
</compile_context>

<pallas_src>
import jax
import jax.numpy as jnp
from jax.experimental import pallas as pl
from jax.experimental.pallas import tpu as pltpu


def _adaln_zero_kernel(cond_ref, w_ref, b_ref, x_ref, o_ref):
    # cond_ref: (1, Nc_blk, Dc)  Nc_blk == 1 (broadcast) or TN (per-token)
    # w_ref:    (Dc, D)          pre-transposed nn.Linear weight (resident)
    # b_ref:    (1, D)           f32 bias (resident)
    # x_ref:    (1, TN, D)
    # o_ref:    (1, TN, D)
    logits = jnp.dot(cond_ref[0], w_ref[...],
                     preferred_element_type=jnp.float32)        # (Nc_blk, D) f32
    gamma = jax.nn.sigmoid(logits + b_ref[...])                 # f32
    # Broadcast over TN when Nc_blk == 1; multiply in x's storage dtype.
    o_ref[0] = x_ref[0] * gamma.astype(x_ref.dtype)


def adaln_zero(x, condition, weight_t, bias, *, tn=None):
    """x: (B, N, D); condition: (B, Dc) or (B, N, Dc);
    weight_t: (Dc, D) (transposed nn.Linear weight); bias: (D,)."""
    B, N, D = x.shape
    if condition.ndim == 2:
        condition = condition[:, None, :]                       # (B, 1, Dc)
    Bc, Nc, Dc = condition.shape
    assert Bc == B and Nc in (1, N), "condition must be (B, Dc) or (B, N, Dc)"
    assert weight_t.shape == (Dc, D)
    assert bias.shape == (D,)

    x_bytes = jnp.dtype(x.dtype).itemsize
    if tn is None:
        # ~2 MiB per streamed x tile (double-buffered x + out stays well inside
        # every generation's scoped-VMEM default), capped at 512 rows.
        rows = max(8, (2 * 1024 * 1024) // max(1, D * x_bytes))
        tn = min(N, 512, rows)
    tn = int(tn)
    if tn < N:
        tn = max(8, (tn // 8) * 8)      # second-minor (sublane) alignment
    else:
        tn = N                          # full axis: no divisibility constraint
    grid = (B, pl.cdiv(N, tn))

    if Nc == 1:
        # Recompute the (1, D) gamma per N-tile: negligible work, keeps both
        # grid axes "parallel" and avoids any scratch / reduction axis.
        cond_spec = pl.BlockSpec((1, 1, Dc), lambda b, n: (b, 0, 0))
    else:
        cond_spec = pl.BlockSpec((1, tn, Dc), lambda b, n: (b, n, 0))

    bias2d = bias.astype(jnp.float32).reshape(1, D)

    # Rough scoped-VMEM need (double-buffered x/out/cond tiles + resident W and
    # bias), floored at the 32 MiB default and capped below v7x's 64 MiB.
    est = 4 * tn * D * x_bytes
    est += 2 * (1 if Nc == 1 else tn) * Dc * jnp.dtype(condition.dtype).itemsize
    est += Dc * D * jnp.dtype(weight_t.dtype).itemsize + 4 * D
    vmem_limit = int(min(max(2 * est, 32 * 1024 * 1024), 56 * 1024 * 1024))

    return pl.pallas_call(
        _adaln_zero_kernel,
        out_shape=jax.ShapeDtypeStruct((B, N, D), x.dtype),
        grid_spec=pltpu.PrefetchScalarGridSpec(
            num_scalar_prefetch=0,
            grid=grid,
            in_specs=[
                cond_spec,                                         # condition
                pl.BlockSpec((Dc, D), lambda b, n: (0, 0)),        # W^T (resident)
                pl.BlockSpec((1, D), lambda b, n: (0, 0)),         # bias (resident)
                pl.BlockSpec((1, tn, D), lambda b, n: (b, n, 0)),  # x tile
            ],
            out_specs=pl.BlockSpec((1, tn, D), lambda b, n: (b, n, 0)),
        ),
        compiler_params=pltpu.CompilerParams(
            dimension_semantics=("parallel", "parallel"),
            vmem_limit_bytes=vmem_limit),
    )(condition, weight_t, bias2d, x)


def adaln_zero_ref(x, condition, weight_t, bias):
    if condition.ndim == 2:
        condition = condition[:, None, :]
    gamma = jax.nn.sigmoid(
        jnp.einsum("bnc,cd->bnd", condition.astype(jnp.float32),
                   weight_t.astype(jnp.float32)) + bias.astype(jnp.float32))
    return (x.astype(jnp.float32) * gamma).astype(x.dtype)


if __name__ == "__main__":
    key = jax.random.PRNGKey(0)
    kx, kc, kw, kx2, kc2 = jax.random.split(key, 5)

    # Case 1: module-default init (zero weight, bias = -2.0),
    # broadcast condition (B, Dc), dim_condition == dim.
    B, N, D = 2, 8, 32
    Dc = D
    x = jax.random.normal(kx, (B, N, D), dtype=jnp.float32)
    cond = jax.random.normal(kc, (B, Dc), dtype=jnp.float32)
    weight_t = jnp.zeros((Dc, D), dtype=jnp.float32)        # W^T, init zeros
    bias = jnp.full((D,), -2.0, dtype=jnp.float32)          # init -2.0

    out = jax.block_until_ready(adaln_zero(x, cond, weight_t, bias))
    ref = adaln_zero_ref(x, cond, weight_t, bias)
    assert out.shape == (B, N, D)
    assert jnp.allclose(out, ref, atol=1e-5, rtol=1e-5), "case 1 mismatch"

    # Case 2: random weights, per-token condition (B, N, Dc), lane-dense D=128,
    # tn forced to 8 so the sequence axis is actually tiled (grid = (B, 2)).
    B2, N2, D2, Dc2 = 2, 16, 128, 64
    x2 = jax.random.normal(kx2, (B2, N2, D2), dtype=jnp.float32)
    cond2 = jax.random.normal(kc2, (B2, N2, Dc2), dtype=jnp.float32)
    w2_t = 0.05 * jax.random.normal(kw, (Dc2, D2), dtype=jnp.float32)
    b2 = jnp.full((D2,), -2.0, dtype=jnp.float32)

    out2 = jax.block_until_ready(adaln_zero(x2, cond2, w2_t, b2, tn=8))
    ref2 = adaln_zero_ref(x2, cond2, w2_t, b2)
    assert out2.shape == (B2, N2, D2)
    assert jnp.allclose(out2, ref2, atol=1e-4, rtol=1e-4), "case 2 mismatch"

    print("KERNEL_OK")
</pallas_src>

<mosaic_0001>
module attributes {stable_mosaic.version = 11 : i64} {
  func.func @_adaln_zero_kernel(%arg0: i32, %arg1: i32, %arg2: memref<1x1x32xf32, #tpu.memory_space<vmem>>, %arg3: memref<32x32xf32, #tpu.memory_space<vmem>>, %arg4: memref<1x32xf32, #tpu.memory_space<vmem>>, %arg5: memref<1x8x32xf32, #tpu.memory_space<vmem>>, %arg6: memref<1x8x32xf32, #tpu.memory_space<vmem>>) attributes {dimension_semantics = [#tpu.dimension_semantics<parallel>, #tpu.dimension_semantics<parallel>], iteration_bounds = array<i64: 2, 1>, scalar_prefetch = 0 : i64, scratch_operands = 0 : i64, tpu.core_type = #tpu.core_type<tc>, window_params = [{transform_indices = @transform_0, window_bounds = array<i64: 1, 1, 32>}, {pipeline_mode = #tpu.pipeline_mode<synchronous>, transform_indices = @transform_1, window_bounds = array<i64: 32, 32>}, {pipeline_mode = #tpu.pipeline_mode<synchronous>, transform_indices = @transform_2, window_bounds = array<i64: 1, 32>}, {transform_indices = @transform_3, window_bounds = array<i64: 1, 8, 32>}, {transform_indices = @transform_4, window_bounds = array<i64: 1, 8, 32>}]} {
    %c0 = arith.constant 0 : index
    %c0_0 = arith.constant 0 : index
    %c0_1 = arith.constant 0 : index
    %0 = vector.load %arg2[%c0, %c0_0, %c0_1] : memref<1x1x32xf32, #tpu.memory_space<vmem>>, vector<1x1x32xf32>
    %1 = vector.shape_cast %0 : vector<1x1x32xf32> to vector<1x32xf32>
    %c0_2 = arith.constant 0 : index
    %c0_3 = arith.constant 0 : index
    %2 = vector.load %arg3[%c0_2, %c0_3] : memref<32x32xf32, #tpu.memory_space<vmem>>, vector<32x32xf32>
    %cst = arith.constant dense<0.000000e+00> : vector<1x32xf32>
    %3 = tpu.matmul %1, %2, %cst {dimension_numbers = #tpu.dot_dimension_numbers<[1], [0], [0], [1], [0, 0, 1, 1], [], []>} : vector<1x32xf32>, vector<32x32xf32>, vector<1x32xf32> -> vector<1x32xf32>
    %c0_4 = arith.constant 0 : index
    %c0_5 = arith.constant 0 : index
    %4 = vector.load %arg4[%c0_4, %c0_5] : memref<1x32xf32, #tpu.memory_space<vmem>>, vector<1x32xf32>
    %5 = arith.addf %3, %4 : vector<1x32xf32>
    %6 = arith.negf %5 : vector<1x32xf32>
    %7 = math.exp %6 : vector<1x32xf32>
    %cst_6 = arith.constant 1.000000e+00 : f32
    %8 = vector.broadcast %cst_6 : f32 to vector<1x32xf32>
    %9 = arith.addf %8, %7 : vector<1x32xf32>
    %10 = arith.divf %8, %9 : vector<1x32xf32>
    %c0_7 = arith.constant 0 : index
    %c0_8 = arith.constant 0 : index
    %c0_9 = arith.constant 0 : index
    %11 = vector.load %arg5[%c0_7, %c0_8, %c0_9] : memref<1x8x32xf32, #tpu.memory_space<vmem>>, vector<1x8x32xf32>
    %12 = vector.shape_cast %11 : vector<1x8x32xf32> to vector<8x32xf32>
    %13 = vector.broadcast %10 : vector<1x32xf32> to vector<8x32xf32>
    %14 = arith.mulf %12, %13 : vector<8x32xf32>
    %c0_10 = arith.constant 0 : index
    %c0_11 = arith.constant 0 : index
    %c0_12 = arith.constant 0 : index
    %15 = vector.load %arg6[%c0_10, %c0_11, %c0_12] : memref<1x8x32xf32, #tpu.memory_space<vmem>>, vector<1x8x32xf32>
    %16 = vector.shape_cast %15 : vector<1x8x32xf32> to vector<8x32xf32>
    %17 = vector.shape_cast %14 : vector<8x32xf32> to vector<1x8x32xf32>
    tpu.vector_store %arg6[%c0_10, %c0_11, %c0_12], %17 {strides = array<i32>} : memref<1x8x32xf32, #tpu.memory_space<vmem>>, vector<1x8x32xf32>,
    return
  }
  func.func @transform_0(%arg0: i32, %arg1: i32) -> (i32, i32, i32) {
    %c0_i32 = arith.constant 0 : i32
    %c0_i32_0 = arith.constant 0 : i32
    %c0_i32_1 = arith.constant 0 : i32
    return %arg0, %c0_i32, %c0_i32_0 : i32, i32, i32
  }
  func.func @transform_1(%arg0: i32, %arg1: i32) -> (i32, i32) {
    %c0_i32 = arith.constant 0 : i32
    %c0_i32_0 = arith.constant 0 : i32
    %c0_i32_1 = arith.constant 0 : i32
    return %c0_i32, %c0_i32_0 : i32, i32
  }
  func.func @transform_2(%arg0: i32, %arg1: i32) -> (i32, i32) {
    %c0_i32 = arith.constant 0 : i32
    %c0_i32_0 = arith.constant 0 : i32
    %c0_i32_1 = arith.constant 0 : i32
    return %c0_i32, %c0_i32_0 : i32, i32
  }
  func.func @transform_3(%arg0: i32, %arg1: i32) -> (i32, i32, i32) {
    %c0_i32 = arith.constant 0 : i32
    %c0_i32_0 = arith.constant 0 : i32
    return %arg0, %arg1, %c0_i32 : i32, i32, i32
  }
  func.func @transform_4(%arg0: i32, %arg1: i32) -> (i32, i32, i32) {
    %c0_i32 = arith.constant 0 : i32
    %c0_i32_0 = arith.constant 0 : i32
    return %arg0, %arg1, %c0_i32 : i32, i32, i32
  }
}

</mosaic_0001>

<bundles_post_ra>
// kernel: tpu_custom_call.1
= control target key start
LH: loop header
LB: loop body
LE: loop exit
PB: predicated region body
PF: predicated region fallthrough
CT: control target
= control target key end

     0   :  { %s1103_s0 = inlined_call_operand.hbm [shape: f32[2,1,32], index: 0, kind: input, shape index: {}]   ;;  %s1104_s1 = inlined_call_operand.hbm [shape: f32[32,32], index: 1, kind: input, shape index: {}]   ;;  %s1105_s2 = inlined_call_operand.vmem [shape: f32[1,32], index: 2, kind: input, shape index: {}]   ;;  %s1106_s3 = inlined_call_operand.hbm [shape: f32[2,8,32], index: 3, kind: input, shape index: {}]   ;;  %s1107_s4 = inlined_call_operand.hbm [shape: f32[2,8,32], index: 4, kind: output, shape index: {}]  }
   0x1   :  { %1117 = sst [smem:[#allocation15_spill]] %s1103_s0 }
   0x2   :  { %9 = vsyncpa [#allocation3], 0 }
   0x3   :  { %11 = vsyncpa [#allocation3 + $0x1], 0 }
   0x4   :  { %12 = vsyncpa [#allocation6], 0 }
   0x5   :  { %13 = vsyncpa [#allocation4], 0 }
   0x6   :  { %15 = vsyncpa [#allocation4 + $0x1], 0  ;;  %s832_s15 = smov 0   ;;  %s834_s16 = smov 0  }
   0x7   :  { %s836_s17 = smov 0   ;;  %s838_s18 = smov 0  }
   0x8   :  { %s840_s19 = smov 0   ;;  %s842_s20 = smov 0  }
   0x9 LB: > { %1118 = sst [smem:[#allocation13_spill]] %s792_s19  ;;  %s33_s21 = sadd.s32 1, %s792_s19  ;;  %s796_s20 = sphi %s842_s20, %s21_s20   ;;  %s792_s19 = sphi %s840_s19, %s1138_s19   ;;  %s788_s18 = sphi %s838_s18, %s1137_s18   ;;  %s784_s17 = sphi %s836_s17, %s1141_s17   ;;  %s780_s16 = sphi %s834_s16, %s1140_s16   ;;  %s776_s15 = sphi %s832_s15, %s1139_s15  }
   0xa   : > { %s40_s22 = sadd.s32 1, %s784_s17  ;;  %p35_p0 = scmp.ge.s32.totalorder %s33_s21, 2 }
   0xb   : > { %p47_p1 = scmp.ne.s32.totalorder %s784_s17, %s780_s16  ;;  %p48_p2 = scmp.eq.s32.totalorder %s796_s20, 0 }
   0xc   : > { %s1143_s21 = smov (%p35_p0, %s33_s21), 0  ;;  %p557_p5 = scmp.lt.s32.totalorder %s796_s20, 2 }
   0xd   : > { %1119 = sst [smem:[#allocation14_spill]] %s1143_s21  ;;  %p49_p4 = por %p48_p2, %p47_p1 }
   0xe   : > { %s37_s23 = ssub.s32 %s792_s19, %s1143_s21  ;;  %s191_s24 = sand.u32 1, %s796_s20  }
   0xf   : > { %p38_p6 = scmp.eq.s32.totalorder %s37_s23, 0  ;;  %s193_s25 = sand.u32 1, %s784_s17  }
  0x10   : > { %s496_s26 = sshll.u32 %s792_s19, 4  ;;  %s1120_s0 = sld [smem:[#allocation15_spill]] }
  0x11   : > { %s880_s27 = scalar_select %p38_p6, %s784_s17, %s40_s22  }
  0x12   : > { %s194_s5 = scalar_lea.vmem [#allocation2], %s193_s25  ;;  %p887_p7 = pnand %p557_p5, %p49_p4 }
  0x13   : > { %s201_s6 = sshll.u32 %s194_s5, 4  ;;  %s893_s8 = sshll.u32 %s193_s25, 3  ;;  %s891_s6 = int_to_ptr.vmem [resolvable:$true] %s201_s6 }
  0x14   : > { %s1121_s7 = scalar_select %p887_p7, 1, 0 }
  0x15   : > { %s895_s9 = scalar_lea.sflag [#allocation3], %s191_s24  ;;  %p1111_p9 = pneg %p887_p7 }
  0x16   : > { %s885_s30 = scalar_lea.hbm %s1120_s0, %s496_s26  ;;  %s623_s13 = scalar_lea.hbm %s1120_s0, 32 }
  0x17   : > { %s618_s10 = scalar_lea.hbm %s885_s30, 16  ;;  %p624_p12 = scmp.lt.u32.totalorder %s885_s30, %s1120_s0 }
  0x18   : > { %p619_p8 = scmp.ne.s32.totalorder %s885_s30, %s618_s10  ;;  %p625_p13 = scmp.lt.u32.totalorder %s623_s13, %s618_s10 }
  0x19   : > { %p627_p2 = scmp.lt.u32.totalorder %s618_s10, %s885_s30 }
  0x1a   : > { %p621_p10 = pnand %p1111_p9, %p619_p8  ;;  %p626_p0 = por %p625_p13, %p624_p12 }
  0x1c   : > { %p622_p11 = pneg %p621_p10  ;;  %p628_p4 = por %p627_p2, %p626_p0 }
  0x1e   : > { %p629_p5 = pnand %p628_p4, %p622_p11 }
  0x20   : > { %632 = shalt.err (!%p629_p5)
}
  0x21   : > { %s633_s23 = scalar_lea.vmem %s891_s6, 16  ;;  %s798_s24 = smov [#allocation2]  }
  0x22   : > { %p634_p6 = scmp.ne.s32.totalorder %s891_s6, %s633_s23  ;;  %s638_s25 = sshll.u32 %s798_s24, 4  ;;  %s639_s25 = int_to_ptr.vmem [resolvable:$false] %s638_s25 }
  0x23   : > { %s640_s26 = scalar_lea.vmem %s639_s25, 32  ;;  %p641_p3 = scmp.lt.s32.totalorder %s891_s6, %s639_s25 }
  0x24   : > { %p636_p8 = pnand %p634_p6, %p1111_p9  ;;  %p642_p12 = scmp.lt.s32.totalorder %s640_s26, %s633_s23 }
  0x26   : > { %p637_p10 = pneg %p636_p8  ;;  %p643_p13 = por %p642_p12, %p641_p3 }
  0x28   : > { %p644_p0 = pnand %p643_p13, %p637_p10 }
  0x2a   : > { %647 = shalt.err (!%p644_p0)
}
  0x2b   : > { %548 = dma.hbm_to_vmem [thread:$0]  (!%p887_p7), %s885_s30, 16, %s891_s6, %s895_s9  }
  0x2c   : > { %s924_s28 = sadd.s32 4294967295, %s796_s20   ;;  %s492_s29 = sadd.s32 4294967294, %s796_s20  }
  0x2d   : > { %p53_p3 = scmp.ne.s32.totalorder %s780_s16, %s776_s15  ;;  %p1110_p11 = scmp.eq.s32.totalorder %s924_s28, 0 }
  0x2e   : > { %p149_p2 = scmp.eq.s32.totalorder %s924_s28, 1  ;;  %p155_p4 = scmp.eq.s32.totalorder %s492_s29, 1 }
  0x2f   : > { %p493_p5 = scmp.ge.s32.totalorder %s796_s20, 1  ;;  %p934_p6 = por %p1110_p11, %p53_p3 }
  0x30   : > { %p941_p8 = por %p149_p2, %p47_p1  ;;  %p945_p10 = por %p155_p4, %p53_p3 }
  0x31   : > { %s1122_s5 = scalar_select %p934_p6, 1, 0 }
  0x32   : > { %s1123_s30 = scalar_select %p941_p8, 1, 0 }
  0x33   : > { %s1124_s6 = scalar_select %p945_p10, 1, 0 }
  0x34   : > { %p162_p12 = scmp.lt.s32.totalorder %s796_s20, 3  ;;  %s799_s11 = smov [#allocation5]  }
  0x35   : > { %s174_s12 = sshll.u32 %s799_s11, 4  ;;  %s498_s13 = sshll.u32 %s792_s19, 7  ;;  %s954_s12 = int_to_ptr.vmem [resolvable:$true] %s174_s12 }
  0x36   : > { %p950_p13 = pnand %p493_p5, %p162_p12  ;;  %s968_s24 = scalar_lea.hbm %s1106_s3, %s498_s13 }
  0x37   : > { %s212_s25 = scalar_lea.vmem [#allocation7], %s893_s8  ;;  %s648_s0 = scalar_lea.hbm %s1104_s1, 512 }
  0x38   : > { %s1125_s10 = scalar_select %p950_p13, 1, 0 }
  0x39   : > { %p541_p0 = pneg %p950_p13  ;;  %s220_s26 = sshll.u32 %s212_s25, 4  ;;  %s971_s26 = int_to_ptr.vmem [resolvable:$true] %s220_s26 }
  0x3a   : > { %p649_p3 = scmp.ne.s32.totalorder %s1104_s1, %s648_s0  ;;  %p655_p12 = scmp.lt.u32.totalorder %s648_s0, %s1104_s1 }
  0x3b   : > { %p961_p1 = pnand %p541_p0, %p1110_p11 }
  0x3d   : > { %p650_p2 = pneg %p961_p1 }
  0x3f   : > { %p651_p4 = pnand %p650_p2, %p649_p3 }
  0x41   : > { %p652_p5 = pneg %p651_p4 }
  0x43   : > { %p657_p0 = pnand %p655_p12, %p652_p5 }
  0x45   : > { %660 = shalt.err (!%p657_p0)
}
  0x46   : > { %s661_s8 = scalar_lea.vmem %s954_s12, 512  ;;  %p669_p8 = scmp.lt.s32.totalorder %s954_s12, %s954_s12 }
  0x47   : > { %p662_p11 = scmp.ne.s32.totalorder %s954_s12, %s661_s8  ;;  %p670_p6 = scmp.lt.s32.totalorder %s661_s8, %s661_s8 }
  0x49   : > { %p664_p9 = pnand %p662_p11, %p650_p2  ;;  %p671_p13 = por %p670_p6, %p669_p8 }
  0x4b   : > { %p665_p10 = pneg %p664_p9 }
  0x4d   : > { %p672_p7 = pnand %p671_p13, %p665_p10 }
  0x4f   : > { %675 = shalt.err (!%p672_p7)
}
  0x50   : > { %s800_s19 = smov 128   ;;  %s801_s0 = smov 8  }
  0x51   : > { %544 = dma.hbm_to_vmem [thread:$0]  (!%p961_p1), %s1104_s1, 512, %s954_s12, [#allocation6], %s800_s19, %s800_s19, %s801_s0  }
  0x52   : > { %s676_s25 = scalar_lea.hbm %s968_s24, 128  ;;  %p1127_p11 = scmp.ne.s32.totalorder %s1121_s7, 0 }
  0x53   : > { %p677_p9 = scmp.ne.s32.totalorder %s968_s24, %s676_s25  ;;  %s681_s22 = scalar_lea.hbm %s1106_s3, 256 }
  0x54   : > { %p1128_p6 = pneg %p1127_p11  ;;  %p682_p10 = scmp.lt.u32.totalorder %s968_s24, %s1106_s3 }
  0x55   : > { %p683_p13 = scmp.lt.u32.totalorder %s681_s22, %s676_s25  ;;  %p685_p2 = scmp.lt.u32.totalorder %s676_s25, %s968_s24 }
  0x56   : > { %p679_p8 = pnand %p677_p9, %p1128_p6 }
  0x57   : > { %p684_p3 = por %p683_p13, %p682_p10 }
  0x58   : > { %p680_p7 = pneg %p679_p8 }
  0x59   : > { %p686_p4 = por %p685_p2, %p684_p3 }
  0x5b   : > { %p687_p5 = pnand %p686_p4, %p680_p7 }
  0x5d   : > { %690 = shalt.err (!%p687_p5)
}
  0x5e   : > { %s691_s12 = scalar_lea.vmem %s971_s26, 128  ;;  %p1129_p12 = pmov %p1128_p6 }
  0x5f   : > { %p692_p1 = scmp.ne.s32.totalorder %s971_s26, %s691_s12  ;;  %s802_s14 = smov [#allocation7]  }
  0x60   : > { %s696_s19 = sshll.u32 %s802_s14, 4  ;;  %s697_s19 = int_to_ptr.vmem [resolvable:$false] %s696_s19 }
  0x61   : > { %p694_p0 = pnand %p692_p1, %p1129_p12  ;;  %s698_s0 = scalar_lea.vmem %s697_s19, 256 }
  0x62   : > { %p699_p6 = scmp.lt.s32.totalorder %s971_s26, %s697_s19  ;;  %p700_p8 = scmp.lt.s32.totalorder %s698_s0, %s691_s12 }
  0x63   : > { %p695_p9 = pneg %p694_p0 }
  0x64   : > { %p701_p10 = por %p700_p8, %p699_p6 }
  0x66   : > { %p702_p13 = pnand %p701_p10, %p695_p9 }
  0x68   : > { %705 = shalt.err (!%p702_p13)
}
  0x69   : > { %551 = dma.hbm_to_vmem [thread:$0]  (!%p1127_p11), %s968_s24, 128, %s971_s26, %s895_s9  }
  0x6a   : > { %p1130_p7 = scmp.ne.s32.totalorder %s1125_s10, 0 }
  0x6b   : > { %s231_s21 = sand.u32 (!%p1130_p7), 1, %s924_s28   ;;  %s1022_s13 = sand.u32 (!%p1130_p7), 1, %s780_s16  }
  0x6c   : > { %229 = sbr.rel (%p1130_p7) target bundleno = 390 (0x186), region = 36  ;;  %s232_s25 = scalar_lea.sflag (!%p1130_p7), [#allocation3], %s231_s21 }
  0x6d   : > { %s234_s29 = scalar_lea.vmem (!%p1130_p7), [#allocation2], %s1022_s13  ;;  %p1131_p3 = scmp.ne.s32.totalorder (!%p1130_p7), %s1122_s5, 0 }
  0x73   : > { %759 = dma.done.wait (%p1131_p3), %s232_s25, 16  }
  0x74   : > { %761 = vsyncadd (%p1131_p3), %s232_s25, 4294967280  ;;  %p1132_p2 = scmp.eq.s32.totalorder %s924_s28, 0 }
  0x76   : > { %763 = dma.done.wait (%p1132_p2), [#allocation6], 512   ;;  %p1133_p11 = pmov %p1132_p2 }
  0x77   : > { %s501_s7 = sshll.u32 %s1022_s13, 3 }
  0x78   : > { %765 = vsyncadd (%p1133_p11), [#allocation6], 4294966784  ;;  %s1036_s9 = scalar_lea.vmem [#allocation7], %s501_s7 }
  0x79   : > { %767 = dma.done.wait (%p1131_p3), %s232_s25, 128  }
  0x7a   : > { %769 = vsyncadd (%p1131_p3), %s232_s25, 4294967168  ;;  %v803_v0 = vmov 0.0|0.0   ;;  %vm804_vm0 = vmmov 0   ;;  %v805_v1 = vmov 0.0   ;;  %v277_v2 = vld [vmem:[#allocation5] sm:$0xff]  ;;  %v278_v3 = vld [vmem:[#allocation5 + $0x8] sm:$0xff]  ;;  %v363_v16 = vlaneseq }
  0x7b   : > { %525 = vmatprep.subr.bf16.mxu0 %v803_v0  ;;  %522 = vmatprep.mubr.msk.f32.mxu0 %vm804_vm0, %v805_v1  ;;  %v279_v4 = vld [vmem:[#allocation5 + $0x10] sm:$0xff]  ;;  %v526_v5 = vpack.c.bf16 %v278_v3, %v277_v2  ;;  %v280_v6 = vld [vmem:[#allocation5 + $0x18] sm:$0xff]  ;;  %vm282_vm1 = vcmask 261120   ;;  %v362_v20 = vld [vmem:[%s1036_s9] sm:$0xff]  ;;  %s506_s10 = sshll.u32 %s788_s18, 7  ;;  %s275_s24 = scalar_lea.vmem [#allocation8], %s501_s7 }
  0x7c   : > { %v529_v7 = vpack.c.bf16 %v280_v6, %v279_v4  ;;  %v276_v8 = vld [vmem:[%s234_s29] sm:$0x1]  ;;  %v364_v17 = vshrl.u32 %v363_v16, 7  ;;  %s384_s26 = sshll.u32 %s275_s24, 4  ;;  %s1053_s23 = scalar_lea.hbm %s1107_s4, %s506_s10  ;;  %s1055_s26 = int_to_ptr.vmem [resolvable:$true] %s384_s26 }
  0x7d   : > { %527 = vmatpush3.bf16.msra.mxu0 %v526_v5  ;;  %v281_v9 = vld [vmem:[%s1105_s2] sm:$0x1]  ;;  %s370_s8 = scalar_lea.sflag [#allocation4], %s1022_s13  ;;  %s706_s12 = scalar_lea.vmem %s1055_s26, 128 }
  0x7e   : > { %528 = vmatprep.subr.bf16.mxu0 %v803_v0  ;;  %v365_v18 = vsub.s32 0, %v364_v17  ;;  %p707_p4 = scmp.ne.s32.totalorder %s1055_s26, %s706_s12  ;;  %p1134_p5 = scmp.ne.s32.totalorder %s1123_s30, 0 }
  0x7f   : > { %s806_s18 = smov [#allocation8]  }
  0x80   : > { %p708_p1 = pnand %p707_p4, %p1134_p5  ;;  %s710_s14 = sshll.u32 %s806_s18, 4  ;;  %s711_s14 = int_to_ptr.vmem [resolvable:$false] %s710_s14 }
  0x81   : > { %530 = vmatpush3.bf16.msra.mxu0 %v529_v7  ;;  %s712_s19 = scalar_lea.vmem %s711_s14, 256  ;;  %p713_p0 = scmp.lt.s32.totalorder %s1055_s26, %s711_s14 }
  0x82   : > { %p709_p12 = pneg %p708_p1  ;;  %p714_p9 = scmp.lt.s32.totalorder %s712_s19, %s706_s12 }
  0x84   : > { %523 = vmatmul.mubr.msk.f32.vlgmr.msra.gmra.mrb[0].mxu0 %vm282_vm1, %v276_v8  ;;  %p715_p6 = por %p714_p9, %p713_p0 }
  0x86   : > { %p716_p8 = pnand %p715_p6, %p709_p12 }
 0x157   : > { %v352_v10 = vpop.f32.mrb[0].mxu0 }
 0x158   : > { %v353_v11 = vadd.f32 %v352_v10, %v281_v9  ;;  %v524_v12 = vpop.f32.mrb[1].mxu0 }
 0x15a   : > { %v504_v13 = vmul.f32 -1.442695, %v353_v11 }
 0x15c   : > { %614 = vpow2.f32 %v504_v13 }
 0x166   : > { %v615_v14 = vpop.eup %614 }
 0x167   : > { %v359_v15 = vadd.f32 1.0, %v615_v14 }
 0x169   : > { %616 = vrcp.f32 %v359_v15 }
 0x173   : > { %v617_v19 = vpop.eup %616 }
 0x174   : > { %v366_v21 = vrot.slane %v617_v19, %v365_v18 }
 0x176   : > { %v367_v22 = vmul.f32 %v366_v21, %v362_v20 }
 0x178   : > { %368 = vst.msk [vmem:[%s275_s24] sm:$0xff] %vm282_vm1, %v367_v22 }
 0x179   : > { %719 = shalt.err (!%p716_p8)
}
 0x17a   : > { %s720_s0 = scalar_lea.hbm %s1053_s23, 128  ;;  %s724_s25 = scalar_lea.hbm %s1107_s4, 256 }
 0x17b   : > { %p721_p10 = scmp.ne.s32.totalorder %s1053_s23, %s720_s0  ;;  %p725_p3 = scmp.lt.u32.totalorder %s1053_s23, %s1107_s4 }
 0x17c   : > { %p726_p2 = scmp.lt.u32.totalorder %s724_s25, %s720_s0  ;;  %p728_p4 = scmp.lt.u32.totalorder %s720_s0, %s1053_s23 }
 0x17d   : > { %p722_p13 = pnand %p721_p10, %p1134_p5 }
 0x17e   : > { %p727_p11 = por %p726_p2, %p725_p3 }
 0x17f   : > { %p723_p7 = pneg %p722_p13 }
 0x180   : > { %p729_p1 = por %p728_p4, %p727_p11 }
 0x182   : > { %p730_p12 = pnand %p729_p1, %p723_p7 }
 0x184   : > { %733 = shalt.err (!%p730_p12)
}
 0x185   : > { %539 = dma.vmem_to_hbm [thread:$0]  (%p1134_p5), %s1055_s26, 128, %s1053_s23, %s370_s8  }
 0x186 PF: > { %s396_s9 = sand.u32 1, %s776_s15   ;;  %p1135_p0 = scmp.ne.s32.totalorder %s1124_s6, 0 }
 0x187   : > { %p1136_p9 = scmp.ge.s32.totalorder %s796_s20, 2  ;;  %s397_s28 = scalar_lea.sflag [#allocation4], %s396_s9 }
 0x189   : > { %p553_p6 = pnand %p1136_p9, %p1135_p0 }
 0x18b   : > { %771 = dma.done.wait (!%p553_p6), %s397_s28, 128  }
 0x18c   : > { %773 = vsyncadd (!%p553_p6), %s397_s28, 4294967168  ;;  %s21_s20 = sadd.s32 1, %s796_s20   ;;  %s1137_s18 = sld [smem:[#allocation13_spill]] }
 0x18d   : > { %p18_p8 = scmp.ge.s32.totalorder %s21_s20, 4   ;;  %s1138_s19 = sld [smem:[#allocation14_spill]] }
 0x18e   : > { %s1139_s15 = smov %s780_s16  ;;  %s1140_s16 = smov %s784_s17 }
 0x18f   : > { %s1141_s17 = smov %s880_s27  ;;  %20 = sbr.rel (!%p18_p8) target bundleno = 9 (0x9), region = 96 }
 0x196   :  { %402 = vsyncpa [#allocation3], 1 }
 0x197   :  { %404 = vsyncpa [#allocation3 + $0x1], 1 }
 0x198   :  { %405 = vsyncpa [#allocation6], 1 }
 0x199   :  { %406 = vsyncpa [#allocation4], 1 }
 0x19a   :  { %408 = vsyncpa [#allocation4 + $0x1], 1 }

</bundles_post_ra>
